<compile_context>
chip_gen: v7x
topology: tpu7x:2x2x1
jax: 0.10.0
libtpu: 0.0.40
codegen_flags: <defaults>
</compile_context>

<pallas_src>
import functools
import math

import jax
import jax.numpy as jnp
import numpy as np
from jax.experimental import pallas as pl
from jax.experimental.pallas import tpu as pltpu


def _mecoq_kernel(y_row_ref, y_col_ref, q_ref, qd_ref, logits_ref, cb_ref, out_ref,
                  qn_sc, s_sc, l_sc, ns_sc, acc_sc,
                  *, temperature, pos_prior, batch, queue_n, tile_n, bm, mkk, ragged):
    f32 = jnp.float32
    bf16 = jnp.bfloat16
    p = pl.program_id(0)            # phase: 0 = stream queue / accumulate L, 1 = loss terms
    t = pl.program_id(1)            # queue column tile
    nt = pl.num_programs(1)

    B = batch
    inv_t = 1.0 / temperature
    shift = inv_t                   # |cos| <= 1 => s <= 1/T ; fixed shift, no online max
    n_cl = batch - 2
    ng_floor = math.exp(-n_cl * inv_t)
    pp_n = pos_prior * n_cl
    inv_1mpp = 1.0 / (1.0 - pos_prior)

    def batch_masks():
        # in-batch affinity rebuilt from int32 labels (never materialized in HBM)
        col = jax.lax.broadcasted_iota(jnp.int32, (B, B), 1)
        row = jax.lax.broadcasted_iota(jnp.int32, (B, B), 0)
        same = y_col_ref[...] == y_row_ref[...]                 # (B, B)
        pos_b = same & (col != row)                             # same label, off-diagonal
        neg_b = jnp.logical_not(same)                           # different label
        return pos_b, neg_b

    def batch_sims():
        # tiny BxB block from cached anchors; QK^T form (contract on last dims),
        # no XLU transpose of a streamed tile is involved.
        qn_b = qn_sc[...].astype(bf16)
        return jax.lax.dot_general(qn_b, qn_b, (((1,), (1,)), ((), ())),
                                   preferred_element_type=f32) * inv_t

    # ---- first step: normalize anchors, in-batch denominator / negative mass ----
    @pl.when((p == 0) & (t == 0))
    def _init():
        qf = q_ref[...].astype(f32)
        qn_sc[...] = qf * jax.lax.rsqrt(
            jnp.maximum(jnp.sum(qf * qf, axis=-1, keepdims=True), 1e-12))
        sb = batch_sims()
        pos_b, neg_b = batch_masks()
        e_b = jnp.where(pos_b | neg_b, jnp.exp(sb - shift), 0.0)
        ns_sc[...] = jnp.sum(jnp.where(neg_b, e_b, 0.0), axis=-1, keepdims=True)
        l_sc[...] = jnp.sum(e_b, axis=-1, keepdims=True)        # in-batch part of L
        acc_sc[...] = jnp.zeros_like(acc_sc)

    # ---- phase 0: stream queue tile (bf16, pre-normalized), cache sims, add to L ----
    @pl.when(p == 0)
    def _phase0():
        qn_b = qn_sc[...].astype(bf16)
        s = jax.lax.dot_general(qn_b, qd_ref[...], (((1,), (1,)), ((), ())),
                                preferred_element_type=f32) * inv_t   # (B, tile_n)
        s_sc[t] = s                                             # VMEM s-cache; no re-stream later
        e = jnp.exp(s - shift)
        if ragged:                                              # static: only when tail is padded
            col = jax.lax.broadcasted_iota(jnp.int32, (B, tile_n), 1) + t * tile_n
            e = jnp.where(col < queue_n, e, 0.0)
        l_sc[...] += jnp.sum(e, axis=-1, keepdims=True)

    # ---- phase 1 (t == 0 only): in-batch positive terms with finalized row stats ----
    @pl.when((p == 1) & (t == 0))
    def _batch_terms():
        L = l_sc[...]
        NS = ns_sc[...]
        sb = batch_sims()
        pos_b, _ = batch_masks()
        e_b = jnp.exp(sb - shift)
        ng = jnp.maximum((NS - pp_n * e_b) * inv_1mpp, ng_floor * L)
        term = jnp.where(pos_b, -(sb - shift) + jnp.log(NS + ng), 0.0)
        acc_sc[...] += jnp.sum(term, axis=-1, keepdims=True)

    # ---- phase 1: queue positive terms from the cached sims (no HBM traffic) ----
    @pl.when(p == 1)
    def _phase1():
        L = l_sc[...]
        NS = ns_sc[...]
        s = s_sc[t]                                             # (B, tile_n) from VMEM cache
        e = jnp.exp(s - shift)
        ng = jnp.maximum((NS - pp_n * e) * inv_1mpp, ng_floor * L)
        term = -(s - shift) + jnp.log(NS + ng)                  # queue cols are all positives
        if ragged:
            col = jax.lax.broadcasted_iota(jnp.int32, (B, tile_n), 1) + t * tile_n
            term = jnp.where(col < queue_n, term, 0.0)
        acc_sc[...] += jnp.sum(term, axis=-1, keepdims=True)

    # ---- final step: finalize contrast, regularizers, pack lane-dense output ----
    @pl.when((p == 1) & (t == nt - 1))
    def _finalize():
        pos_b, _ = batch_masks()
        pos_count = jnp.sum(jnp.where(pos_b, 1.0, 0.0)) + float(B * queue_n)
        contrast = jnp.sum(acc_sc[...]) / jnp.maximum(pos_count, 1.0)

        # logits entropy regularizer on a lane-dense [B, M*K] slab (global sum).
        # NOTE: 1e-30 guard deviates from the reference (which NaNs on exact zeros).
        pv = logits_ref[...].astype(f32)
        logreg = jnp.sum(-pv * jnp.log(jnp.maximum(pv, 1e-30))) * (1.0 / bm)

        # codebook regularizer, closed form: sum_{m,d} (sum_k C[m,k,d])^2 / (M*K*K)
        # cb_ref is the lane-dense (K, M*Dc) transpose -> single sublane reduction.
        csum = jnp.sum(cb_ref[...].astype(f32), axis=0, keepdims=True)
        cbreg = jnp.sum(csum * csum) * (1.0 / mkk)

        lane = jax.lax.broadcasted_iota(jnp.int32, out_ref.shape, 1)
        out_ref[...] = jnp.where(lane == 0, contrast,
                                 jnp.where(lane == 1, logreg,
                                           jnp.where(lane == 2, cbreg, 0.0)))


def mecoq_forward(q, y, queued, logits, codebook, *,
                  temperature, _lambda, gamma, pos_prior, tile_n=None):
    B, D = q.shape
    Qn = queued.shape[0]
    assert Qn >= 1, "empty queue path (_simCLR without queue) not implemented"

    if tile_n is None:
        # big tiles approach the HBM roofline (measured ~85% at 512+ vs ~29% at 128);
        # cap at 1024 to keep [B, tile_n] temporaries comfortably inside the vreg file.
        tile_n = max(128, min(1024, pl.cdiv(Qn, 128) * 128))
    assert tile_n % 128 == 0
    num_tiles = pl.cdiv(Qn, tile_n)
    n_pad_q = num_tiles * tile_n
    ragged = (Qn % tile_n) != 0

    # TODO(synk): in production keep the queue stored pre-normalized, padded and
    # bf16 at enqueue time; this per-call normalize/pad/cast only touches the
    # queue once and exists here to keep the script self-contained.
    qd = queued.astype(jnp.float32)
    qd = qd * jax.lax.rsqrt(jnp.maximum(jnp.sum(qd * qd, axis=-1, keepdims=True), 1e-12))
    qd = jnp.pad(qd, ((0, n_pad_q - Qn), (0, 0))).astype(jnp.bfloat16)

    y32 = y.astype(jnp.int32)
    y_row = y32.reshape(B, 1)
    y_col = y32.reshape(1, B)

    Bl, Ml, K = logits.shape
    logits2d = logits.reshape(Bl, Ml * K)                 # lane-dense slab
    Mc, Kc, Dc = codebook.shape
    cbT = jnp.transpose(codebook, (1, 0, 2)).reshape(Kc, Mc * Dc)   # (K, M*Dc), lane-dense

    # ---- explicit VMEM budget (s-cache + double-buffered queue tiles + residents) ----
    s_cache_bytes = num_tiles * B * tile_n * 4
    stream_bytes = 2 * tile_n * D * 2                     # double-buffered bf16 queue tile
    resident_bytes = 2 * B * D * 4 + Bl * Ml * K * 4 + Kc * Mc * Dc * 4 + 4 * B * 4 + (1 << 20)
    vmem_bytes = s_cache_bytes + 3 * stream_bytes + resident_bytes
    # keep <= ~48 MiB so the same config also fits v7x (64 MiB physical VMEM).
    assert vmem_bytes <= (48 << 20), \
        "s-cache too large for VMEM; switch to bf16 s-cache / HBM s-scratch variant"
    vmem_limit = int(max(vmem_bytes + (4 << 20), 16 << 20))

    kernel = functools.partial(
        _mecoq_kernel,
        temperature=float(temperature), pos_prior=float(pos_prior),
        batch=B, queue_n=Qn, tile_n=tile_n,
        bm=Bl * Ml, mkk=Mc * Kc * Kc, ragged=ragged)

    out = pl.pallas_call(
        kernel,
        out_shape=jax.ShapeDtypeStruct((1, 128), jnp.float32),
        grid_spec=pltpu.PrefetchScalarGridSpec(
            num_scalar_prefetch=0,
            grid=(2, num_tiles),                                      # (phase, queue tile)
            in_specs=[
                pl.BlockSpec((B, 1), lambda p, t: (0, 0)),            # row labels (resident)
                pl.BlockSpec((1, B), lambda p, t: (0, 0)),            # column labels (resident)
                pl.BlockSpec((B, D), lambda p, t: (0, 0)),            # anchors q (resident)
                # queue streamed in phase 0 only; phase 1 pins block 0 -> no re-DMA.
                pl.BlockSpec((tile_n, D), lambda p, t: (t * (1 - p), 0)),
                pl.BlockSpec((Bl, Ml * K), lambda p, t: (0, 0)),      # logits (resident)
                pl.BlockSpec((Kc, Mc * Dc), lambda p, t: (0, 0)),     # codebook^T (resident)
            ],
            out_specs=pl.BlockSpec((1, 128), lambda p, t: (0, 0)),
            scratch_shapes=[
                pltpu.VMEM((B, D), jnp.float32),                      # normalized anchors
                pltpu.VMEM((num_tiles, B, tile_n), jnp.float32),      # s-cache (phase-0 sims)
                pltpu.VMEM((B, 1), jnp.float32),                      # L  (softmax denominator)
                pltpu.VMEM((B, 1), jnp.float32),                      # NS (negative mass)
                pltpu.VMEM((B, 1), jnp.float32),                      # sum of positive terms
            ]),
        compiler_params=pltpu.CompilerParams(
            # both axes carry accumulator state -> sequential.
            dimension_semantics=("arbitrary", "arbitrary"),
            vmem_limit_bytes=vmem_limit),
    )(y_row, y_col, q.astype(jnp.float32), qd, logits2d, cbT)

    contrast = out[0, 0]
    logreg = out[0, 1]
    cbreg = out[0, 2]
    loss = contrast + _lambda * logreg + gamma * cbreg
    return loss, {'contrastive': contrast, 'logits_reg': logreg, 'codebook_reg': cbreg}


def mecoq_reference(q, y, queued, logits, codebook, *,
                    temperature, _lambda, gamma, pos_prior):
    """Plain-JAX reference (full-matrix softmax path) matching kernel semantics.
    Normalized features are bf16-quantized exactly as the kernel streams them."""
    B = q.shape[0]
    Qn = queued.shape[0]

    def nrm(x):
        return x * jax.lax.rsqrt(
            jnp.maximum(jnp.sum(x * x, axis=-1, keepdims=True), 1e-12))

    qn = nrm(q).astype(jnp.bfloat16)
    kn = jnp.concatenate([qn, nrm(queued).astype(jnp.bfloat16)], axis=0)
    sims = jax.lax.dot_general(qn, kn, (((1,), (1,)), ((), ())),
                               preferred_element_type=jnp.float32) / temperature

    eye = jnp.eye(B, dtype=bool)
    same = (y[:, None] == y[None, :]) & (~eye)
    pos_m = jnp.concatenate([same, jnp.ones((B, Qn), dtype=bool)], -1)
    neg_m = jnp.concatenate([(y[:, None] != y[None, :]),
                             jnp.zeros((B, Qn), dtype=bool)], -1)
    valid = pos_m | neg_m
    masked = jnp.where(valid, sims, -1e30)
    probs = jax.nn.softmax(masked, axis=-1) * valid
    neg_sum = jnp.sum(probs * neg_m, axis=-1, keepdims=True)
    N = B - 2
    Ng = jnp.maximum((-pos_prior * N * probs + neg_sum) / (1.0 - pos_prior),
                     math.exp(N * (-1.0 / temperature)))
    term = -jnp.log(jnp.where(pos_m, probs, 1.0) / (neg_sum + Ng))
    contrast = jnp.sum(term * pos_m) / jnp.sum(pos_m)

    logreg = jnp.mean(jnp.sum(-logits * jnp.log(logits), axis=-1))
    cbreg = jnp.mean(jnp.einsum('mkd,mjd->mkj', codebook, codebook))
    loss = contrast + _lambda * logreg + gamma * cbreg
    return loss, contrast, logreg, cbreg


if __name__ == "__main__":
    # Hyperparameters (from MeCoQ.__init__ signature)
    d = 32
    temperature = 0.4
    _lambda = 0.1
    gamma = 0.01
    pos_prior = 0.1

    # Small deterministic shapes
    B, Qn, Mc, K, Dc = 8, 8, 4, 16, 8

    key = jax.random.PRNGKey(0)
    k1, k2, k3, k4 = jax.random.split(key, 4)
    q = jax.random.normal(k1, (B, d), dtype=jnp.float32)
    # paired labels -> every anchor has exactly one in-batch positive
    y = jnp.repeat(jnp.arange(B // 2, dtype=jnp.int32), 2)
    queued = jax.random.normal(k2, (Qn, d), dtype=jnp.float32)
    logits = jax.nn.softmax(jax.random.normal(k3, (B, Mc, K), dtype=jnp.float32), axis=-1)
    codebook = jax.random.normal(k4, (Mc, K, Dc), dtype=jnp.float32)

    loss, aux = mecoq_forward(q, y, queued, logits, codebook,
                              temperature=temperature, _lambda=_lambda,
                              gamma=gamma, pos_prior=pos_prior)
    jax.block_until_ready(loss)

    ref_loss, ref_c, ref_lr, ref_cr = mecoq_reference(
        q, y, queued, logits, codebook,
        temperature=temperature, _lambda=_lambda, gamma=gamma, pos_prior=pos_prior)

    np.testing.assert_allclose(np.asarray(loss), np.asarray(ref_loss), rtol=5e-3, atol=5e-3)
    np.testing.assert_allclose(np.asarray(aux['contrastive']), np.asarray(ref_c), rtol=5e-3, atol=5e-3)
    np.testing.assert_allclose(np.asarray(aux['logits_reg']), np.asarray(ref_lr), rtol=5e-3, atol=5e-3)
    np.testing.assert_allclose(np.asarray(aux['codebook_reg']), np.asarray(ref_cr), rtol=5e-3, atol=5e-3)

    print("KERNEL_OK")
</pallas_src>

<mosaic_0001>
module attributes {stable_mosaic.version = 11 : i64} {
  func.func @_mecoq_kernel(%arg0: i32, %arg1: i32, %arg2: memref<8x1xi32, #tpu.memory_space<vmem>>, %arg3: memref<1x8xi32, #tpu.memory_space<vmem>>, %arg4: memref<8x32xf32, #tpu.memory_space<vmem>>, %arg5: memref<128x32xbf16, #tpu.memory_space<vmem>>, %arg6: memref<8x64xf32, #tpu.memory_space<vmem>>, %arg7: memref<16x32xf32, #tpu.memory_space<vmem>>, %arg8: memref<1x128xf32, #tpu.memory_space<vmem>>, %arg9: memref<8x32xf32, #tpu.memory_space<vmem>>, %arg10: memref<1x8x128xf32, #tpu.memory_space<vmem>>, %arg11: memref<8x1xf32, #tpu.memory_space<vmem>>, %arg12: memref<8x1xf32, #tpu.memory_space<vmem>>, %arg13: memref<8x1xf32, #tpu.memory_space<vmem>>) attributes {dimension_semantics = [#tpu.dimension_semantics<arbitrary>, #tpu.dimension_semantics<arbitrary>], iteration_bounds = array<i64: 2, 1>, scalar_prefetch = 0 : i64, scratch_operands = 5 : i64, tpu.core_type = #tpu.core_type<tc>, window_params = [{pipeline_mode = #tpu.pipeline_mode<synchronous>, transform_indices = @transform_0, window_bounds = array<i64: 8, 1>}, {pipeline_mode = #tpu.pipeline_mode<synchronous>, transform_indices = @transform_1, window_bounds = array<i64: 1, 8>}, {pipeline_mode = #tpu.pipeline_mode<synchronous>, transform_indices = @transform_2, window_bounds = array<i64: 8, 32>}, {transform_indices = @transform_3, window_bounds = array<i64: 128, 32>}, {pipeline_mode = #tpu.pipeline_mode<synchronous>, transform_indices = @transform_4, window_bounds = array<i64: 8, 64>}, {pipeline_mode = #tpu.pipeline_mode<synchronous>, transform_indices = @transform_5, window_bounds = array<i64: 16, 32>}, {pipeline_mode = #tpu.pipeline_mode<synchronous>, transform_indices = @transform_6, window_bounds = array<i64: 1, 128>}]} {
    %c0_i32 = arith.constant 0 : i32
    %0 = arith.cmpi eq, %arg0, %c0_i32 : i32
    %c0_i32_0 = arith.constant 0 : i32
    %1 = arith.cmpi eq, %arg1, %c0_i32_0 : i32
    %2 = arith.andi %0, %1 : i1
    %3 = arith.extui %2 : i1 to i32
    %c0_i32_1 = arith.constant 0 : i32
    %4 = arith.cmpi ne, %3, %c0_i32_1 : i32
    scf.if %4 {
      %c0 = arith.constant 0 : index
      %c0_11 = arith.constant 0 : index
      %21 = vector.load %arg4[%c0, %c0_11] : memref<8x32xf32, #tpu.memory_space<vmem>>, vector<8x32xf32>
      %22 = arith.mulf %21, %21 : vector<8x32xf32>
      %cst = arith.constant dense<0.000000e+00> : vector<8xf32>
      %23 = vector.multi_reduction <add>, %22, %cst [1] : vector<8x32xf32> to vector<8xf32>
      %24 = vector.shape_cast %23 : vector<8xf32> to vector<8x1xf32>
      %cst_12 = arith.constant 9.99999996E-13 : f32
      %25 = vector.broadcast %cst_12 : f32 to vector<8x1xf32>
      %26 = arith.maximumf %24, %25 : vector<8x1xf32>
      %27 = math.rsqrt %26 : vector<8x1xf32>
      %28 = vector.broadcast %27 : vector<8x1xf32> to vector<8x32xf32>
      %29 = arith.mulf %21, %28 : vector<8x32xf32>
      %c0_13 = arith.constant 0 : index
      %c0_14 = arith.constant 0 : index
      %30 = vector.load %arg9[%c0_13, %c0_14] : memref<8x32xf32, #tpu.memory_space<vmem>>, vector<8x32xf32>
      tpu.vector_store %arg9[%c0_13, %c0_14], %29 {strides = array<i32>} : memref<8x32xf32, #tpu.memory_space<vmem>>, vector<8x32xf32>,
      %c0_15 = arith.constant 0 : index
      %c0_16 = arith.constant 0 : index
      %31 = vector.load %arg9[%c0_15, %c0_16] : memref<8x32xf32, #tpu.memory_space<vmem>>, vector<8x32xf32>
      %32 = arith.truncf %31 : vector<8x32xf32> to vector<8x32xbf16>
      %cst_17 = arith.constant dense<0.000000e+00> : vector<8x8xf32>
      %33 = tpu.matmul %32, %32, %cst_17 {dimension_numbers = #tpu.dot_dimension_numbers<[1], [1], [0], [0], [0, 0, 1, 0], [], []>} : vector<8x32xbf16>, vector<8x32xbf16>, vector<8x8xf32> -> vector<8x8xf32>
      %cst_18 = arith.constant 2.500000e+00 : f32
      %34 = vector.broadcast %cst_18 : f32 to vector<8x8xf32>
      %35 = arith.mulf %33, %34 : vector<8x8xf32>
      %36 = tpu.iota {dimensions = array<i32: 1>} : vector<8x8xi32>
      %37 = tpu.iota {dimensions = array<i32: 0>} : vector<8x8xi32>
      %c0_19 = arith.constant 0 : index
      %c0_20 = arith.constant 0 : index
      %38 = vector.load %arg3[%c0_19, %c0_20] : memref<1x8xi32, #tpu.memory_space<vmem>>, vector<1x8xi32>
      %c0_21 = arith.constant 0 : index
      %c0_22 = arith.constant 0 : index
      %39 = vector.load %arg2[%c0_21, %c0_22] : memref<8x1xi32, #tpu.memory_space<vmem>>, vector<8x1xi32>
      %40 = vector.broadcast %38 : vector<1x8xi32> to vector<8x8xi32>
      %41 = vector.broadcast %39 : vector<8x1xi32> to vector<8x8xi32>
      %42 = arith.cmpi eq, %40, %41 : vector<8x8xi32>
      %43 = arith.cmpi ne, %36, %37 : vector<8x8xi32>
      %44 = arith.andi %42, %43 : vector<8x8xi1>
      %cst_23 = arith.constant dense<true> : vector<8x8xi1>
      %45 = arith.xori %42, %cst_23 : vector<8x8xi1>
      %46 = arith.ori %44, %45 : vector<8x8xi1>
      %cst_24 = arith.constant 2.500000e+00 : f32
      %47 = vector.broadcast %cst_24 : f32 to vector<8x8xf32>
      %48 = arith.subf %35, %47 : vector<8x8xf32>
      %49 = math.exp %48 : vector<8x8xf32>
      %cst_25 = arith.constant 0.000000e+00 : f32
      %50 = vector.broadcast %cst_25 : f32 to vector<8x8xf32>
      %51 = arith.select %46, %49, %50 : vector<8x8xi1>, vector<8x8xf32>
      %cst_26 = arith.constant 0.000000e+00 : f32
      %52 = vector.broadcast %cst_26 : f32 to vector<8x8xf32>
      %53 = arith.select %45, %51, %52 : vector<8x8xi1>, vector<8x8xf32>
      %cst_27 = arith.constant dense<0.000000e+00> : vector<8xf32>
      %54 = vector.multi_reduction <add>, %53, %cst_27 [1] : vector<8x8xf32> to vector<8xf32>
      %55 = vector.shape_cast %54 : vector<8xf32> to vector<8x1xf32>
      %c0_28 = arith.constant 0 : index
      %c0_29 = arith.constant 0 : index
      %56 = vector.load %arg12[%c0_28, %c0_29] : memref<8x1xf32, #tpu.memory_space<vmem>>, vector<8x1xf32>
      tpu.vector_store %arg12[%c0_28, %c0_29], %55 {strides = array<i32>} : memref<8x1xf32, #tpu.memory_space<vmem>>, vector<8x1xf32>,
      %cst_30 = arith.constant dense<0.000000e+00> : vector<8xf32>
      %57 = vector.multi_reduction <add>, %51, %cst_30 [1] : vector<8x8xf32> to vector<8xf32>
      %58 = vector.shape_cast %57 : vector<8xf32> to vector<8x1xf32>
      %c0_31 = arith.constant 0 : index
      %c0_32 = arith.constant 0 : index
      %59 = vector.load %arg11[%c0_31, %c0_32] : memref<8x1xf32, #tpu.memory_space<vmem>>, vector<8x1xf32>
      tpu.vector_store %arg11[%c0_31, %c0_32], %58 {strides = array<i32>} : memref<8x1xf32, #tpu.memory_space<vmem>>, vector<8x1xf32>,
      %cst_33 = arith.constant 0.000000e+00 : f32
      %60 = vector.broadcast %cst_33 : f32 to vector<8x1xf32>
      %c0_34 = arith.constant 0 : index
      %c0_35 = arith.constant 0 : index
      %61 = vector.load %arg13[%c0_34, %c0_35] : memref<8x1xf32, #tpu.memory_space<vmem>>, vector<8x1xf32>
      tpu.vector_store %arg13[%c0_34, %c0_35], %60 {strides = array<i32>} : memref<8x1xf32, #tpu.memory_space<vmem>>, vector<8x1xf32>,
    } else {
    }
    %c0_i32_2 = arith.constant 0 : i32
    %5 = arith.cmpi eq, %arg0, %c0_i32_2 : i32
    %6 = arith.extui %5 : i1 to i32
    %c0_i32_3 = arith.constant 0 : i32
    %7 = arith.cmpi ne, %6, %c0_i32_3 : i32
    scf.if %7 {
      %c0 = arith.constant 0 : index
      %c0_11 = arith.constant 0 : index
      %21 = vector.load %arg9[%c0, %c0_11] : memref<8x32xf32, #tpu.memory_space<vmem>>, vector<8x32xf32>
      %22 = arith.truncf %21 : vector<8x32xf32> to vector<8x32xbf16>
      %c0_12 = arith.constant 0 : index
      %c0_13 = arith.constant 0 : index
      %23 = vector.load %arg5[%c0_12, %c0_13] : memref<128x32xbf16, #tpu.memory_space<vmem>>, vector<128x32xbf16>
      %cst = arith.constant dense<0.000000e+00> : vector<8x128xf32>
      %24 = tpu.matmul %22, %23, %cst {dimension_numbers = #tpu.dot_dimension_numbers<[1], [1], [0], [0], [0, 0, 1, 0], [], []>} : vector<8x32xbf16>, vector<128x32xbf16>, vector<8x128xf32> -> vector<8x128xf32>
      %cst_14 = arith.constant 2.500000e+00 : f32
      %25 = vector.broadcast %cst_14 : f32 to vector<8x128xf32>
      %26 = arith.mulf %24, %25 : vector<8x128xf32>
      %27 = arith.index_cast %arg1 : i32 to index
      %c0_15 = arith.constant 0 : index
      %c0_16 = arith.constant 0 : index
      %28 = vector.load %arg10[%27, %c0_15, %c0_16] : memref<1x8x128xf32, #tpu.memory_space<vmem>>, vector<1x8x128xf32>
      %29 = vector.shape_cast %28 : vector<1x8x128xf32> to vector<8x128xf32>
      %30 = vector.shape_cast %26 : vector<8x128xf32> to vector<1x8x128xf32>
      tpu.vector_store %arg10[%27, %c0_15, %c0_16], %30 {strides = array<i32>} : memref<1x8x128xf32, #tpu.memory_space<vmem>>, vector<1x8x128xf32>,
      %cst_17 = arith.constant 2.500000e+00 : f32
      %31 = vector.broadcast %cst_17 : f32 to vector<8x128xf32>
      %32 = arith.subf %26, %31 : vector<8x128xf32>
      %33 = math.exp %32 : vector<8x128xf32>
      %34 = tpu.iota {dimensions = array<i32: 1>} : vector<8x128xi32>
      %c128_i32 = arith.constant 128 : i32
      %35 = arith.muli %arg1, %c128_i32 : i32
      %36 = vector.broadcast %35 : i32 to vector<8x128xi32>
      %37 = arith.addi %34, %36 : vector<8x128xi32>
      %c8_i32 = arith.constant 8 : i32
      %38 = vector.broadcast %c8_i32 : i32 to vector<8x128xi32>
      %39 = arith.cmpi slt, %37, %38 : vector<8x128xi32>
      %cst_18 = arith.constant 0.000000e+00 : f32
      %40 = vector.broadcast %cst_18 : f32 to vector<8x128xf32>
      %41 = arith.select %39, %33, %40 : vector<8x128xi1>, vector<8x128xf32>
      %c0_19 = arith.constant 0 : index
      %c0_20 = arith.constant 0 : index
      %42 = vector.load %arg11[%c0_19, %c0_20] : memref<8x1xf32, #tpu.memory_space<vmem>>, vector<8x1xf32>
      %cst_21 = arith.constant dense<0.000000e+00> : vector<8xf32>
      %43 = vector.multi_reduction <add>, %41, %cst_21 [1] : vector<8x128xf32> to vector<8xf32>
      %44 = vector.shape_cast %43 : vector<8xf32> to vector<8x1xf32>
      %45 = arith.addf %42, %44 : vector<8x1xf32>
      %c0_22 = arith.constant 0 : index
      %c0_23 = arith.constant 0 : index
      %46 = vector.load %arg11[%c0_22, %c0_23] : memref<8x1xf32, #tpu.memory_space<vmem>>, vector<8x1xf32>
      tpu.vector_store %arg11[%c0_22, %c0_23], %45 {strides = array<i32>} : memref<8x1xf32, #tpu.memory_space<vmem>>, vector<8x1xf32>,
    } else {
    }
    %c1_i32 = arith.constant 1 : i32
    %8 = arith.cmpi eq, %arg0, %c1_i32 : i32
    %c0_i32_4 = arith.constant 0 : i32
    %9 = arith.cmpi eq, %arg1, %c0_i32_4 : i32
    %10 = arith.andi %8, %9 : i1
    %11 = arith.extui %10 : i1 to i32
    %c0_i32_5 = arith.constant 0 : i32
    %12 = arith.cmpi ne, %11, %c0_i32_5 : i32
    scf.if %12 {
      %c0 = arith.constant 0 : index
      %c0_11 = arith.constant 0 : index
      %21 = vector.load %arg11[%c0, %c0_11] : memref<8x1xf32, #tpu.memory_space<vmem>>, vector<8x1xf32>
      %c0_12 = arith.constant 0 : index
      %c0_13 = arith.constant 0 : index
      %22 = vector.load %arg12[%c0_12, %c0_13] : memref<8x1xf32, #tpu.memory_space<vmem>>, vector<8x1xf32>
      %c0_14 = arith.constant 0 : index
      %c0_15 = arith.constant 0 : index
      %23 = vector.load %arg9[%c0_14, %c0_15] : memref<8x32xf32, #tpu.memory_space<vmem>>, vector<8x32xf32>
      %24 = arith.truncf %23 : vector<8x32xf32> to vector<8x32xbf16>
      %cst = arith.constant dense<0.000000e+00> : vector<8x8xf32>
      %25 = tpu.matmul %24, %24, %cst {dimension_numbers = #tpu.dot_dimension_numbers<[1], [1], [0], [0], [0, 0, 1, 0], [], []>} : vector<8x32xbf16>, vector<8x32xbf16>, vector<8x8xf32> -> vector<8x8xf32>
      %cst_16 = arith.constant 2.500000e+00 : f32
      %26 = vector.broadcast %cst_16 : f32 to vector<8x8xf32>
      %27 = arith.mulf %25, %26 : vector<8x8xf32>
      %28 = tpu.iota {dimensions = array<i32: 1>} : vector<8x8xi32>
      %29 = tpu.iota {dimensions = array<i32: 0>} : vector<8x8xi32>
      %c0_17 = arith.constant 0 : index
      %c0_18 = arith.constant 0 : index
      %30 = vector.load %arg3[%c0_17, %c0_18] : memref<1x8xi32, #tpu.memory_space<vmem>>, vector<1x8xi32>
      %c0_19 = arith.constant 0 : index
      %c0_20 = arith.constant 0 : index
      %31 = vector.load %arg2[%c0_19, %c0_20] : memref<8x1xi32, #tpu.memory_space<vmem>>, vector<8x1xi32>
      %32 = vector.broadcast %30 : vector<1x8xi32> to vector<8x8xi32>
      %33 = vector.broadcast %31 : vector<8x1xi32> to vector<8x8xi32>
      %34 = arith.cmpi eq, %32, %33 : vector<8x8xi32>
      %35 = arith.cmpi ne, %28, %29 : vector<8x8xi32>
      %36 = arith.andi %34, %35 : vector<8x8xi1>
      %cst_21 = arith.constant 2.500000e+00 : f32
      %37 = vector.broadcast %cst_21 : f32 to vector<8x8xf32>
      %38 = arith.subf %27, %37 : vector<8x8xf32>
      %39 = math.exp %38 : vector<8x8xf32>
      %cst_22 = arith.constant 6.000000e-01 : f32
      %40 = vector.broadcast %cst_22 : f32 to vector<8x8xf32>
      %41 = arith.mulf %40, %39 : vector<8x8xf32>
      %42 = vector.broadcast %22 : vector<8x1xf32> to vector<8x8xf32>
      %43 = arith.subf %42, %41 : vector<8x8xf32>
      %cst_23 = arith.constant 1.11111116 : f32
      %44 = vector.broadcast %cst_23 : f32 to vector<8x8xf32>
      %45 = arith.mulf %43, %44 : vector<8x8xf32>
      %cst_24 = arith.constant 3.05902319E-7 : f32
      %46 = vector.broadcast %cst_24 : f32 to vector<8x1xf32>
      %47 = arith.mulf %46, %21 : vector<8x1xf32>
      %48 = vector.broadcast %47 : vector<8x1xf32> to vector<8x8xf32>
      %49 = arith.maximumf %45, %48 : vector<8x8xf32>
      %cst_25 = arith.constant 2.500000e+00 : f32
      %50 = vector.broadcast %cst_25 : f32 to vector<8x8xf32>
      %51 = arith.subf %27, %50 : vector<8x8xf32>
      %cst_26 = arith.constant 0.000000e+00 : f32
      %52 = vector.broadcast %cst_26 : f32 to vector<8x8xf32>
      %53 = arith.subf %52, %51 : vector<8x8xf32>
      %54 = vector.broadcast %22 : vector<8x1xf32> to vector<8x8xf32>
      %55 = arith.addf %54, %49 : vector<8x8xf32>
      %56 = math.log %55 : vector<8x8xf32>
      %57 = arith.addf %53, %56 : vector<8x8xf32>
      %cst_27 = arith.constant 0.000000e+00 : f32
      %58 = vector.broadcast %cst_27 : f32 to vector<8x8xf32>
      %59 = arith.select %36, %57, %58 : vector<8x8xi1>, vector<8x8xf32>
      %c0_28 = arith.constant 0 : index
      %c0_29 = arith.constant 0 : index
      %60 = vector.load %arg13[%c0_28, %c0_29] : memref<8x1xf32, #tpu.memory_space<vmem>>, vector<8x1xf32>
      %cst_30 = arith.constant dense<0.000000e+00> : vector<8xf32>
      %61 = vector.multi_reduction <add>, %59, %cst_30 [1] : vector<8x8xf32> to vector<8xf32>
      %62 = vector.shape_cast %61 : vector<8xf32> to vector<8x1xf32>
      %63 = arith.addf %60, %62 : vector<8x1xf32>
      %c0_31 = arith.constant 0 : index
      %c0_32 = arith.constant 0 : index
      %64 = vector.load %arg13[%c0_31, %c0_32] : memref<8x1xf32, #tpu.memory_space<vmem>>, vector<8x1xf32>
      tpu.vector_store %arg13[%c0_31, %c0_32], %63 {strides = array<i32>} : memref<8x1xf32, #tpu.memory_space<vmem>>, vector<8x1xf32>,
    } else {
    }
    %c1_i32_6 = arith.constant 1 : i32
    %13 = arith.cmpi eq, %arg0, %c1_i32_6 : i32
    %14 = arith.extui %13 : i1 to i32
    %c0_i32_7 = arith.constant 0 : i32
    %15 = arith.cmpi ne, %14, %c0_i32_7 : i32
    scf.if %15 {
      %c0 = arith.constant 0 : index
      %c0_11 = arith.constant 0 : index
      %21 = vector.load %arg11[%c0, %c0_11] : memref<8x1xf32, #tpu.memory_space<vmem>>, vector<8x1xf32>
      %c0_12 = arith.constant 0 : index
      %c0_13 = arith.constant 0 : index
      %22 = vector.load %arg12[%c0_12, %c0_13] : memref<8x1xf32, #tpu.memory_space<vmem>>, vector<8x1xf32>
      %23 = arith.index_cast %arg1 : i32 to index
      %c0_14 = arith.constant 0 : index
      %c0_15 = arith.constant 0 : index
      %24 = vector.load %arg10[%23, %c0_14, %c0_15] : memref<1x8x128xf32, #tpu.memory_space<vmem>>, vector<1x8x128xf32>
      %25 = vector.shape_cast %24 : vector<1x8x128xf32> to vector<8x128xf32>
      %cst = arith.constant 2.500000e+00 : f32
      %26 = vector.broadcast %cst : f32 to vector<8x128xf32>
      %27 = arith.subf %25, %26 : vector<8x128xf32>
      %28 = math.exp %27 : vector<8x128xf32>
      %cst_16 = arith.constant 6.000000e-01 : f32
      %29 = vector.broadcast %cst_16 : f32 to vector<8x128xf32>
      %30 = arith.mulf %29, %28 : vector<8x128xf32>
      %31 = vector.broadcast %22 : vector<8x1xf32> to vector<8x128xf32>
      %32 = arith.subf %31, %30 : vector<8x128xf32>
      %cst_17 = arith.constant 1.11111116 : f32
      %33 = vector.broadcast %cst_17 : f32 to vector<8x128xf32>
      %34 = arith.mulf %32, %33 : vector<8x128xf32>
      %cst_18 = arith.constant 3.05902319E-7 : f32
      %35 = vector.broadcast %cst_18 : f32 to vector<8x1xf32>
      %36 = arith.mulf %35, %21 : vector<8x1xf32>
      %37 = vector.broadcast %36 : vector<8x1xf32> to vector<8x128xf32>
      %38 = arith.maximumf %34, %37 : vector<8x128xf32>
      %cst_19 = arith.constant 2.500000e+00 : f32
      %39 = vector.broadcast %cst_19 : f32 to vector<8x128xf32>
      %40 = arith.subf %25, %39 : vector<8x128xf32>
      %cst_20 = arith.constant 0.000000e+00 : f32
      %41 = vector.broadcast %cst_20 : f32 to vector<8x128xf32>
      %42 = arith.subf %41, %40 : vector<8x128xf32>
      %43 = vector.broadcast %22 : vector<8x1xf32> to vector<8x128xf32>
      %44 = arith.addf %43, %38 : vector<8x128xf32>
      %45 = math.log %44 : vector<8x128xf32>
      %46 = arith.addf %42, %45 : vector<8x128xf32>
      %47 = tpu.iota {dimensions = array<i32: 1>} : vector<8x128xi32>
      %c128_i32 = arith.constant 128 : i32
      %48 = arith.muli %arg1, %c128_i32 : i32
      %49 = vector.broadcast %48 : i32 to vector<8x128xi32>
      %50 = arith.addi %47, %49 : vector<8x128xi32>
      %c8_i32 = arith.constant 8 : i32
      %51 = vector.broadcast %c8_i32 : i32 to vector<8x128xi32>
      %52 = arith.cmpi slt, %50, %51 : vector<8x128xi32>
      %cst_21 = arith.constant 0.000000e+00 : f32
      %53 = vector.broadcast %cst_21 : f32 to vector<8x128xf32>
      %54 = arith.select %52, %46, %53 : vector<8x128xi1>, vector<8x128xf32>
      %c0_22 = arith.constant 0 : index
      %c0_23 = arith.constant 0 : index
      %55 = vector.load %arg13[%c0_22, %c0_23] : memref<8x1xf32, #tpu.memory_space<vmem>>, vector<8x1xf32>
      %cst_24 = arith.constant dense<0.000000e+00> : vector<8xf32>
      %56 = vector.multi_reduction <add>, %54, %cst_24 [1] : vector<8x128xf32> to vector<8xf32>
      %57 = vector.shape_cast %56 : vector<8xf32> to vector<8x1xf32>
      %58 = arith.addf %55, %57 : vector<8x1xf32>
      %c0_25 = arith.constant 0 : index
      %c0_26 = arith.constant 0 : index
      %59 = vector.load %arg13[%c0_25, %c0_26] : memref<8x1xf32, #tpu.memory_space<vmem>>, vector<8x1xf32>
      tpu.vector_store %arg13[%c0_25, %c0_26], %58 {strides = array<i32>} : memref<8x1xf32, #tpu.memory_space<vmem>>, vector<8x1xf32>,
    } else {
    }
    %c1_i32_8 = arith.constant 1 : i32
    %16 = arith.cmpi eq, %arg0, %c1_i32_8 : i32
    %c0_i32_9 = arith.constant 0 : i32
    %17 = arith.cmpi eq, %arg1, %c0_i32_9 : i32
    %18 = arith.andi %16, %17 : i1
    %19 = arith.extui %18 : i1 to i32
    %c0_i32_10 = arith.constant 0 : i32
    %20 = arith.cmpi ne, %19, %c0_i32_10 : i32
    scf.if %20 {
      %21 = tpu.iota {dimensions = array<i32: 1>} : vector<8x8xi32>
      %22 = tpu.iota {dimensions = array<i32: 0>} : vector<8x8xi32>
      %c0 = arith.constant 0 : index
      %c0_11 = arith.constant 0 : index
      %23 = vector.load %arg3[%c0, %c0_11] : memref<1x8xi32, #tpu.memory_space<vmem>>, vector<1x8xi32>
      %c0_12 = arith.constant 0 : index
      %c0_13 = arith.constant 0 : index
      %24 = vector.load %arg2[%c0_12, %c0_13] : memref<8x1xi32, #tpu.memory_space<vmem>>, vector<8x1xi32>
      %25 = vector.broadcast %23 : vector<1x8xi32> to vector<8x8xi32>
      %26 = vector.broadcast %24 : vector<8x1xi32> to vector<8x8xi32>
      %27 = arith.cmpi eq, %25, %26 : vector<8x8xi32>
      %28 = arith.cmpi ne, %21, %22 : vector<8x8xi32>
      %29 = arith.andi %27, %28 : vector<8x8xi1>
      %cst = arith.constant 1.000000e+00 : f32
      %cst_14 = arith.constant 0.000000e+00 : f32
      %30 = vector.broadcast %cst : f32 to vector<8x8xf32>
      %31 = vector.broadcast %cst_14 : f32 to vector<8x8xf32>
      %32 = arith.select %29, %30, %31 : vector<8x8xi1>, vector<8x8xf32>
      %33 = vector.shape_cast %32 : vector<8x8xf32> to vector<1x8x8xf32>
      %cst_15 = arith.constant dense<0.000000e+00> : vector<1xf32>
      %34 = vector.multi_reduction <add>, %33, %cst_15 [1, 2] : vector<1x8x8xf32> to vector<1xf32>
      %35 = vector.shape_cast %34 : vector<1xf32> to vector<1x1x1xf32>
      %36 = vector.extract %35[0, 0, 0] : f32 from vector<1x1x1xf32>
      %cst_16 = arith.constant 6.400000e+01 : f32
      %37 = arith.addf %36, %cst_16 : f32
      %c0_17 = arith.constant 0 : index
      %c0_18 = arith.constant 0 : index
      %38 = vector.load %arg13[%c0_17, %c0_18] : memref<8x1xf32, #tpu.memory_space<vmem>>, vector<8x1xf32>
      %39 = vector.shape_cast %38 : vector<8x1xf32> to vector<1x8x1xf32>
      %cst_19 = arith.constant dense<0.000000e+00> : vector<1xf32>
      %40 = vector.multi_reduction <add>, %39, %cst_19 [1, 2] : vector<1x8x1xf32> to vector<1xf32>
      %41 = vector.shape_cast %40 : vector<1xf32> to vector<1x1x1xf32>
      %42 = vector.extract %41[0, 0, 0] : f32 from vector<1x1x1xf32>
      %cst_20 = arith.constant 1.000000e+00 : f32
      %43 = arith.maximumf %37, %cst_20 : f32
      %44 = arith.divf %42, %43 : f32
      %c0_21 = arith.constant 0 : index
      %c0_22 = arith.constant 0 : index
      %45 = vector.load %arg6[%c0_21, %c0_22] : memref<8x64xf32, #tpu.memory_space<vmem>>, vector<8x64xf32>
      %cst_23 = arith.constant 0.000000e+00 : f32
      %46 = vector.broadcast %cst_23 : f32 to vector<8x64xf32>
      %47 = arith.subf %46, %45 : vector<8x64xf32>
      %cst_24 = arith.constant 1.000000e-30 : f32
      %48 = vector.broadcast %cst_24 : f32 to vector<8x64xf32>
      %49 = arith.maximumf %45, %48 : vector<8x64xf32>
      %50 = math.log %49 : vector<8x64xf32>
      %51 = arith.mulf %47, %50 : vector<8x64xf32>
      %52 = vector.shape_cast %51 : vector<8x64xf32> to vector<1x8x64xf32>
      %cst_25 = arith.constant dense<0.000000e+00> : vector<1xf32>
      %53 = vector.multi_reduction <add>, %52, %cst_25 [1, 2] : vector<1x8x64xf32> to vector<1xf32>
      %54 = vector.shape_cast %53 : vector<1xf32> to vector<1x1x1xf32>
      %55 = vector.extract %54[0, 0, 0] : f32 from vector<1x1x1xf32>
      %cst_26 = arith.constant 3.125000e-02 : f32
      %56 = arith.mulf %55, %cst_26 : f32
      %c0_27 = arith.constant 0 : index
      %c0_28 = arith.constant 0 : index
      %57 = vector.load %arg7[%c0_27, %c0_28] : memref<16x32xf32, #tpu.memory_space<vmem>>, vector<16x32xf32>
      %cst_29 = arith.constant dense<0.000000e+00> : vector<32xf32>
      %58 = vector.multi_reduction <add>, %57, %cst_29 [0] : vector<16x32xf32> to vector<32xf32>
      %59 = vector.shape_cast %58 : vector<32xf32> to vector<1x32xf32>
      %60 = arith.mulf %59, %59 : vector<1x32xf32>
      %61 = vector.shape_cast %60 : vector<1x32xf32> to vector<1x1x32xf32>
      %cst_30 = arith.constant dense<0.000000e+00> : vector<1xf32>
      %62 = vector.multi_reduction <add>, %61, %cst_30 [1, 2] : vector<1x1x32xf32> to vector<1xf32>
      %63 = vector.shape_cast %62 : vector<1xf32> to vector<1x1x1xf32>
      %64 = vector.extract %63[0, 0, 0] : f32 from vector<1x1x1xf32>
      %cst_31 = arith.constant 9.765625E-4 : f32
      %65 = arith.mulf %64, %cst_31 : f32
      %66 = tpu.iota {dimensions = array<i32: 1>} : vector<1x128xi32>
      %c0_i32_32 = arith.constant 0 : i32
      %67 = vector.broadcast %c0_i32_32 : i32 to vector<1x128xi32>
      %68 = arith.cmpi eq, %66, %67 : vector<1x128xi32>
      %c1_i32_33 = arith.constant 1 : i32
      %69 = vector.broadcast %c1_i32_33 : i32 to vector<1x128xi32>
      %70 = arith.cmpi eq, %66, %69 : vector<1x128xi32>
      %c2_i32 = arith.constant 2 : i32
      %71 = vector.broadcast %c2_i32 : i32 to vector<1x128xi32>
      %72 = arith.cmpi eq, %66, %71 : vector<1x128xi32>
      %cst_34 = arith.constant 0.000000e+00 : f32
      %73 = vector.broadcast %65 : f32 to vector<1x128xf32>
      %74 = vector.broadcast %cst_34 : f32 to vector<1x128xf32>
      %75 = arith.select %72, %73, %74 : vector<1x128xi1>, vector<1x128xf32>
      %76 = vector.broadcast %56 : f32 to vector<1x128xf32>
      %77 = arith.select %70, %76, %75 : vector<1x128xi1>, vector<1x128xf32>
      %78 = vector.broadcast %44 : f32 to vector<1x128xf32>
      %79 = arith.select %68, %78, %77 : vector<1x128xi1>, vector<1x128xf32>
      %c0_35 = arith.constant 0 : index
      %c0_36 = arith.constant 0 : index
      %80 = vector.load %arg8[%c0_35, %c0_36] : memref<1x128xf32, #tpu.memory_space<vmem>>, vector<1x128xf32>
      tpu.vector_store %arg8[%c0_35, %c0_36], %79 {strides = array<i32>} : memref<1x128xf32, #tpu.memory_space<vmem>>, vector<1x128xf32>,
    } else {
    }
    return
  }
  func.func @transform_0(%arg0: i32, %arg1: i32) -> (i32, i32) {
    %c0_i32 = arith.constant 0 : i32
    %c0_i32_0 = arith.constant 0 : i32
    %c0_i32_1 = arith.constant 0 : i32
    return %c0_i32, %c0_i32_0 : i32, i32
  }
  func.func @transform_1(%arg0: i32, %arg1: i32) -> (i32, i32) {
    %c0_i32 = arith.constant 0 : i32
    %c0_i32_0 = arith.constant 0 : i32
    %c0_i32_1 = arith.constant 0 : i32
    return %c0_i32, %c0_i32_0 : i32, i32
  }
  func.func @transform_2(%arg0: i32, %arg1: i32) -> (i32, i32) {
    %c0_i32 = arith.constant 0 : i32
    %c0_i32_0 = arith.constant 0 : i32
    %c0_i32_1 = arith.constant 0 : i32
    return %c0_i32, %c0_i32_0 : i32, i32
  }
  func.func @transform_3(%arg0: i32, %arg1: i32) -> (i32, i32) {
    %c1_i32 = arith.constant 1 : i32
    %0 = arith.subi %c1_i32, %arg0 : i32
    %1 = arith.muli %arg1, %0 : i32
    %c0_i32 = arith.constant 0 : i32
    %c0_i32_0 = arith.constant 0 : i32
    return %1, %c0_i32 : i32, i32
  }
  func.func @transform_4(%arg0: i32, %arg1: i32) -> (i32, i32) {
    %c0_i32 = arith.constant 0 : i32
    %c0_i32_0 = arith.constant 0 : i32
    %c0_i32_1 = arith.constant 0 : i32
    return %c0_i32, %c0_i32_0 : i32, i32
  }
  func.func @transform_5(%arg0: i32, %arg1: i32) -> (i32, i32) {
    %c0_i32 = arith.constant 0 : i32
    %c0_i32_0 = arith.constant 0 : i32
    %c0_i32_1 = arith.constant 0 : i32
    return %c0_i32, %c0_i32_0 : i32, i32
  }
  func.func @transform_6(%arg0: i32, %arg1: i32) -> (i32, i32) {
    %c0_i32 = arith.constant 0 : i32
    %c0_i32_0 = arith.constant 0 : i32
    %c0_i32_1 = arith.constant 0 : i32
    return %c0_i32, %c0_i32_0 : i32, i32
  }
}

</mosaic_0001>

<bundles_post_ra>
// kernel: tpu_custom_call.1
= control target key start
LH: loop header
LB: loop body
LE: loop exit
PB: predicated region body
PF: predicated region fallthrough
CT: control target
= control target key end

     0   :  { %11 = vsyncpa [#allocation8], 0  ;;  %s1084_s21 = smov 0   ;;  %s1086_s22 = smov 0   ;;  %s1228_s0 = inlined_call_operand.vmem [shape: s32[8,1], index: 0, kind: input, shape index: {}]   ;;  %s1229_s1 = inlined_call_operand.vmem [shape: s32[1,8], index: 1, kind: input, shape index: {}]   ;;  %s1230_s2 = inlined_call_operand.vmem [shape: f32[8,32], index: 2, kind: input, shape index: {}]   ;;  %s1231_s3 = inlined_call_operand.vmem [shape: bf16[128,32], index: 3, kind: input, shape index: {}]   ;;  %s1232_s4 = inlined_call_operand.vmem [shape: f32[8,64], index: 4, kind: input, shape index: {}]   ;;  %s1233_s5 = inlined_call_operand.vmem [shape: f32[16,32], index: 5, kind: input, shape index: {}]   ;;  %s1234_s6 = inlined_call_operand.hbm [shape: f32[1,128], index: 6, kind: output, shape index: {}]  }
   0x1   :  { %s1088_s23 = smov 0  }
   0x2 LB: > { %s818_s24 = sadd.s32 4294967295, %s1033_s23   ;;  %s29_s25 = sadd.s32 1, %s1029_s22  ;;  %s1033_s23 = sphi %s1088_s23, %s17_s23   ;;  %s1029_s22 = sphi %s1086_s22, %s1237_s22   ;;  %s1025_s21 = sphi %s1084_s21, %s1236_s21  }
   0x3   : > { %p31_p0 = scmp.ge.s32.totalorder %s29_s25, 2  ;;  %p822_p1 = scmp.ge.s32.totalorder %s1033_s23, 1 }
   0x4   : > { %p229_p2 = scmp.lt.s32.totalorder %s1033_s23, 3 }
   0x5   : > { %s1239_s25 = smov (%p31_p0, %s29_s25), 0 }
   0x6   : > { %p230_p3 = pnand %p822_p1, %p229_p2 }
   0x7   : > { %p267_p4 = scmp.eq.s32.totalorder (!%p230_p3), %s1025_s21, 0 }
   0x8   : > { %233 = sbr.rel (%p230_p3) target bundleno = 2164 (0x874), region = 44 }
   0xf   : > { %272 = sbr.rel (!%p267_p4) target bundleno = 573 (0x23d), region = 48  ;;  %v273_v0 = vld [vmem:[%s1230_s2] sm:$0xff] (%p267_p4)  ;;  %vm275_vm0 = vcmask (%p267_p4), 261120   ;;  %v1035_v3 = vmov (%p267_p4), 0.0   ;;  %vm1036_vm1 = vmmov (%p267_p4), 0   ;;  %v1037_v5 = vmov (%p267_p4), 0  }
  0x10   : > { %v274_v1 = vmul.f32 (%p267_p4), %v273_v0, %v273_v0  ;;  %864 = vmatprep.subr.bf16.mxu0 (%p267_p4), %v1035_v3  ;;  %866 = vmatprep.mubr.msk.bf16.mxu0 (%p267_p4), %vm1036_vm1, %v1035_v3  ;;  %v334_v4 = vld [vmem:[%s1228_s0] sm:$0xff] (%p267_p4)  ;;  %vm356_vm2 = vcmask (%p267_p4), 7168   ;;  %v329_v16 = vlaneseq (%p267_p4)  ;;  %vm1038_vm5 = vmmov (%p267_p4), 1  }
  0x11   : > { %950 = vset.pattern.permute.xlu0 (%p267_p4), %v1037_v5  ;;  %362 = vst.msk [vmem:[#allocation6] sm:$0xff] (%p267_p4), %vm356_vm2, %v1035_v3  ;;  %v825_v23 = vld [vmem:[%s1229_s1] ss:$0 sm:$0xff] (%p267_p4)  ;;  %vm352_vm9 = vcmask (%p267_p4), 64512  }
  0x12   : > { %v276_v2 = vsel (%p267_p4), %vm275_vm0, %v274_v1, 0.0  ;;  %v330_v21 = vand.u32 (%p267_p4), 127, %v329_v16  ;;  %v332_v22 = vshrl.u32 (%p267_p4), %v329_v16, 7 }
  0x13   : > { %277 = vadd.xlane.f32.xlu0 (%p267_p4), %v276_v2 }
  0x14   : > { %vm343_vm4 = vcmp.ne.s32.totalorder (%p267_p4), %v330_v21, %v332_v22 }
  0x29   : > { %340 = vperm.xlu0 %950, %v334_v4  }
  0xa0   : > { %v278_v6 = vpop.xlane.xlu0 %277 }
  0xa1   : > { %v279_v7 = vmax.f32 %v278_v6, 1e-12 }
  0xa3   : > { %951 = vrsqrt.f32 %v279_v7 }
  0xa8   : > { %v341_v24 = vpop.permute.xlu0 %340 }
  0xa9   : > { %vm342_vm3 = vcmp.eq.s32.totalorder %v825_v23, %v341_v24 }
  0xaa   : > { %vm345_vm6 = vmxor %vm342_vm3, %vm1038_vm5 }
  0xab   : > { %vm344_vm7 = vmand %vm342_vm3, %vm343_vm4 }
  0xac   : > { %vm346_vm8 = vmor %vm344_vm7, %vm345_vm6 }
  0xad   : > { %v952_v8 = vpop.eup %951 }
  0xae   : > { %v281_v9 = vmul.f32 %v952_v8, %v273_v0 }
  0xb0   : > { %282 = vst.msk [vmem:[#allocation2] sm:$0xff] %vm275_vm0, %v281_v9 }
  0xb7   : > { %v283_v10 = vld [vmem:[#allocation2] sm:$0xff] }
  0xb8   : > { %v284_v11 = vpack.c.bf16 %v283_v10, %v283_v10 }
  0xba   : > { %v286_v12 = vsel %vm275_vm0, %v284_v11, 0 }
  0xbb   : > { %865 = vmatpush3.bf16.xpose.msra.mxu0 %v286_v12 }
  0xc2   : > { %867 = vmatmul.mubr.msk.bf16.vlgmr.msra.gmra.mrb[0].mxu0 %vm275_vm0, %v284_v11 }
 0x195   : > { %v322_v13 = vpop.f32.mrb[0].mxu0 }
 0x196   : > { %v328_v14 = vmul.f32 2.5, %v322_v13  ;;  %v868_v15 = vpop.f32.mrb[1].mxu0 }
 0x197   : > { %v325_v17 = vpop.f32.mrb[2].mxu0 }
 0x198   : > { %v826_v18 = vadd.f32 -2.5, %v328_v14  ;;  %v869_v19 = vpop.f32.mrb[3].mxu0 }
 0x19a   : > { %v348_v20 = vmul.f32 1.442695, %v826_v18 }
 0x19c   : > { %953 = vpow2.f32 %v348_v20 }
 0x1a6   : > { %v954_v25 = vpop.eup %953 }
 0x1a7   : > { %v350_v26 = vsel %vm346_vm8, %v954_v25, 0.0 }
 0x1a8   : > { %v351_v27 = vsel %vm345_vm6, %v350_v26, 0.0  ;;  %v358_v29 = vsel %vm352_vm9, %v350_v26, 0.0 }
 0x1a9   : > { %v353_v28 = vsel %vm352_vm9, %v351_v27, 0.0 }
 0x1aa   : > { %354 = vadd.xlane.f32.xlu1 %v353_v28 }
 0x1ae   : > { %359 = vadd.xlane.f32.xlu1 %v358_v29 }
 0x237   : > { %v355_v30 = vpop.xlane.xlu1 %354 }
 0x238   : > { %357 = vst.msk [vmem:[#allocation5] sm:$0xff] %vm356_vm2, %v355_v30 }
 0x23b   : > { %v360_v31 = vpop.xlane.xlu1 %359 }
 0x23c   : > { %361 = vst.msk [vmem:[#allocation4] sm:$0xff] %vm356_vm2, %v360_v31 }
 0x23d PF: > { %p827_p5 = scmp.ne.s32.totalorder %s1025_s21, 0 }
 0x23e   : > { %v955_v32 = vld [vmem:[%s1231_s3] sm:$0xff] (!%p827_p5)   ;;  %v1039_v33 = vmov (!%p827_p5), 0.0   ;;  %vm424_vm10 = vcmask (!%p827_p5), 261120   ;;  %v956_v35 = vld [vmem:[%s1231_s3 + $0x8] sm:$0xff] (!%p827_p5)   ;;  %vm1040_vm11 = vmmov (!%p827_p5), 0   ;;  %v957_v37 = vld [vmem:[%s1231_s3 + $0x10] sm:$0xff] (!%p827_p5)   ;;  %v499_v58 = vlaneseq (!%p827_p5) }
 0x23f   : > { %365 = sbr.rel (%p827_p5) target bundleno = 1014 (0x3f6), region = 52  ;;  %870 = vmatprep.subr.bf16.mxu0 (!%p827_p5), %v1039_v33  ;;  %v429_v34 = vsel (!%p827_p5), %vm424_vm10, %v955_v32, 0  ;;  %v432_v36 = vsel (!%p827_p5), %vm424_vm10, %v956_v35, 0  ;;  %886 = vmatprep.mubr.msk.bf16.mxu0 (!%p827_p5), %vm1040_vm11, %v1039_v33  ;;  %v435_v38 = vsel (!%p827_p5), %vm424_vm10, %v957_v37, 0  ;;  %v958_v39 = vld [vmem:[%s1231_s3 + $0x18] sm:$0xff] (!%p827_p5)   ;;  %v959_v41 = vld [vmem:[%s1231_s3 + $0x20] sm:$0xff] (!%p827_p5)  }
 0x240   : > { %871 = vmatpush3.bf16.xpose.msra.mxu0 (!%p827_p5), %v429_v34  ;;  %v438_v40 = vsel (!%p827_p5), %vm424_vm10, %v958_v39, 0  ;;  %v441_v42 = vsel (!%p827_p5), %vm424_vm10, %v959_v41, 0  ;;  %v960_v43 = vld [vmem:[%s1231_s3 + $0x28] sm:$0xff] (!%p827_p5)   ;;  %v961_v45 = vld [vmem:[%s1231_s3 + $0x30] sm:$0xff] (!%p827_p5)   ;;  %v962_v47 = vld [vmem:[%s1231_s3 + $0x38] sm:$0xff] (!%p827_p5)   ;;  %v500_v59 = vand.u32 (!%p827_p5), 127, %v499_v58 }
 0x241   : > { %872 = vmatprep.subr.bf16.mxu0 (!%p827_p5), %v1039_v33  ;;  %v444_v44 = vsel (!%p827_p5), %vm424_vm10, %v960_v43, 0  ;;  %v447_v46 = vsel (!%p827_p5), %vm424_vm10, %v961_v45, 0  ;;  %v450_v48 = vsel (!%p827_p5), %vm424_vm10, %v962_v47, 0  ;;  %v366_v49 = vld [vmem:[#allocation2] sm:$0xff] (!%p827_p5)  ;;  %vm510_vm13 = vcmask (!%p827_p5), 7168  }
 0x242   : > { %v367_v50 = vpack.c.bf16 (!%p827_p5), %v366_v49, %v366_v49  ;;  %vm504_vm12 = vcmp.lt.s32.totalorder (!%p827_p5), %v500_v59, 8 }
 0x243   : > { %v506_v62 = vld [vmem:[#allocation4] sm:$0xff] (!%p827_p5) }
 0x248   : > { %873 = vmatpush3.bf16.xpose.msra.mxu0 %v432_v36 }
 0x249   : > { %874 = vmatprep.subr.bf16.mxu0 %v1039_v33 }
 0x250   : > { %875 = vmatpush3.bf16.xpose.msra.mxu0 %v435_v38 }
 0x251   : > { %876 = vmatprep.subr.bf16.mxu0 %v1039_v33 }
 0x258   : > { %877 = vmatpush3.bf16.xpose.msra.mxu0 %v438_v40 }
 0x259   : > { %878 = vmatprep.subr.bf16.mxu0 %v1039_v33 }
 0x260   : > { %879 = vmatpush3.bf16.xpose.msra.mxu0 %v441_v42 }
 0x261   : > { %880 = vmatprep.subr.bf16.mxu0 %v1039_v33 }
 0x268   : > { %881 = vmatpush3.bf16.xpose.msra.mxu0 %v444_v44 }
 0x269   : > { %882 = vmatprep.subr.bf16.mxu0 %v1039_v33 }
 0x270   : > { %883 = vmatpush3.bf16.xpose.msra.mxu0 %v447_v46 }
 0x271   : > { %884 = vmatprep.subr.bf16.mxu0 %v1039_v33 }
 0x278   : > { %885 = vmatpush3.bf16.xpose.msra.mxu0 %v450_v48 }
 0x27f   : > { %887 = vmatmul.mubr.msk.bf16.vlgmr.msra.gmra.mrb[0].mxu0 %vm424_vm10, %v367_v50 }
 0x352   : > { %v486_v51 = vpop.f32.mrb[0].mxu0 }
 0x353   : > { %v492_v52 = vmul.f32 2.5, %v486_v51  ;;  %v888_v53 = vpop.f32.mrb[1].mxu0 }
 0x354   : > { %v489_v54 = vpop.f32.mrb[2].mxu0 }
 0x355   : > { %495 = vst [vmem:[#allocation3] sm:$0xff] %v492_v52  ;;  %v837_v55 = vadd.f32 -2.5, %v492_v52  ;;  %v889_v56 = vpop.f32.mrb[3].mxu0 }
 0x357   : > { %v497_v57 = vmul.f32 1.442695, %v837_v55 }
 0x359   : > { %963 = vpow2.f32 %v497_v57 }
 0x363   : > { %v964_v60 = vpop.eup %963 }
 0x364   : > { %v505_v61 = vsel %vm504_vm12, %v964_v60, 0.0 }
 0x365   : > { %507 = vadd.xlane.f32.xlu0 %v505_v61 }
 0x3f2   : > { %v508_v63 = vpop.xlane.xlu0 %507 }
 0x3f3   : > { %v509_v0 = vadd.f32 %v508_v63, %v506_v62 }
 0x3f5   : > { %511 = vst.msk [vmem:[#allocation4] sm:$0xff] %vm510_vm13, %v509_v0 }
 0x3f6 PF: > { %p512_p6 = scmp.eq.s32.totalorder %s1025_s21, 1 }
 0x3f7   : > { %v519_v1 = vld [vmem:[#allocation2] sm:$0xff] (%p512_p6)  ;;  %vm521_vm14 = vcmask (%p512_p6), 261120   ;;  %v518_v2 = vld [vmem:[#allocation5] sm:$0xff] (%p512_p6)  ;;  %v1041_v3 = vmov (%p512_p6), 0.0   ;;  %vm1042_vm15 = vmmov (%p512_p6), 0   ;;  %v571_v6 = vld [vmem:[%s1228_s0] sm:$0xff] (%p512_p6)  ;;  %v566_v25 = vlaneseq (%p512_p6) }
 0x3f8   : > { %516 = sbr.rel (!%p512_p6) target bundleno = 1427 (0x593), region = 56  ;;  %890 = vmatprep.subr.bf16.mxu0 (%p512_p6), %v1041_v3  ;;  %v520_v4 = vpack.c.bf16 (%p512_p6), %v519_v1, %v519_v1  ;;  %892 = vmatprep.mubr.msk.bf16.mxu0 (%p512_p6), %vm1042_vm15, %v1041_v3  ;;  %v1043_v7 = vmov (%p512_p6), 0   ;;  %v840_v29 = vld [vmem:[%s1229_s1] ss:$0 sm:$0xff] (%p512_p6)  ;;  %vm607_vm3 = vcmask (%p512_p6), 64512   ;;  %v606_v36 = vld [vmem:[#allocation6] sm:$0xff] (%p512_p6) }
 0x3f9   : > { %965 = vset.pattern.permute.xlu0 (%p512_p6), %v1043_v7  ;;  %966 = vset.pattern.permute.xlu1 (%p512_p6), %v1043_v7  ;;  %v567_v26 = vand.u32 (%p512_p6), 127, %v566_v25  ;;  %v569_v27 = vshrl.u32 (%p512_p6), %v566_v25, 7  ;;  %vm612_vm4 = vcmask (%p512_p6), 7168  }
 0x3fa   : > { %v523_v8 = vsel (%p512_p6), %vm521_vm14, %v520_v4, 0  ;;  %588 = vperm.xlu0 (%p512_p6), %965, %v518_v2   ;;  %577 = vperm.xlu1 (%p512_p6), %966, %v571_v6  }
 0x3fb   : > { %891 = vmatpush3.bf16.xpose.msra.mxu0 (%p512_p6), %v523_v8  ;;  %vm580_vm1 = vcmp.ne.s32.totalorder (%p512_p6), %v567_v26, %v569_v27 }
 0x3fc   : > { %v517_v5 = vld [vmem:[#allocation4] sm:$0xff] (%p512_p6) }
 0x3fd   : > { %v593_v9 = vmul.f32 (%p512_p6), 3.0590232e-07, %v517_v5 }
 0x3ff   : > { %596 = vperm.xlu0 %965, %v593_v9  }
 0x402   : > { %893 = vmatmul.mubr.msk.bf16.vlgmr.msra.gmra.mrb[0].mxu0 %vm521_vm14, %v520_v4 }
 0x479   : > { %v589_v18 = vpop.permute.xlu0 %588  ;;  %v578_v28 = vpop.permute.xlu1 %577 }
 0x47a   : > { %vm579_vm0 = vcmp.eq.s32.totalorder %v840_v29, %v578_v28 }
 0x47b   : > { %vm581_vm2 = vmand %vm579_vm0, %vm580_vm1 }
 0x47e   : > { %v597_v22 = vpop.permute.xlu0 %596 }
 0x4d5   : > { %v559_v10 = vpop.f32.mrb[0].mxu0 }
 0x4d6   : > { %v565_v11 = vmul.f32 2.5, %v559_v10  ;;  %v894_v12 = vpop.f32.mrb[1].mxu0 }
 0x4d7   : > { %v562_v13 = vpop.f32.mrb[2].mxu0 }
 0x4d8   : > { %v841_v14 = vadd.f32 -2.5, %v565_v11  ;;  %v895_v15 = vpop.f32.mrb[3].mxu0 }
 0x4da   : > { %v583_v16 = vmul.f32 1.442695, %v841_v14  ;;  %v600_v31 = vsub.f32 0.0, %v841_v14 }
 0x4dc   : > { %967 = vpow2.f32 %v583_v16 }
 0x4e6   : > { %v968_v17 = vpop.eup %967 }
 0x4e7   : > { %v585_v19 = vmul.f32 0.6, %v968_v17 }
 0x4e9   : > { %v591_v20 = vsub.f32 %v589_v18, %v585_v19 }
 0x4eb   : > { %v592_v21 = vmul.f32 1.1111112, %v591_v20 }
 0x4ed   : > { %v599_v23 = vmax.f32 %v592_v21, %v597_v22 }
 0x4ef   : > { %v601_v24 = vadd.f32 %v599_v23, %v589_v18 }
 0x4f1   : > { %969 = vlog2.f32 %v601_v24 }
 0x4fb   : > { %v970_v30 = vpop.eup %969 }
 0x4fc   : > { %v603_v32 = vmul.f32 0.6931472, %v970_v30 }
 0x4fe   : > { %v604_v33 = vadd.f32 %v603_v32, %v600_v31 }
 0x500   : > { %v605_v34 = vsel %vm581_vm2, %v604_v33, 0.0 }
 0x501   : > { %v608_v35 = vsel %vm607_vm3, %v605_v34, 0.0 }
 0x502   : > { %609 = vadd.xlane.f32.xlu1 %v608_v35 }
 0x58f   : > { %v610_v37 = vpop.xlane.xlu1 %609 }
 0x590   : > { %v611_v38 = vadd.f32 %v610_v37, %v606_v36 }
 0x592   : > { %613 = vst.msk [vmem:[#allocation6] sm:$0xff] %vm612_vm4, %v611_v38 }
 0x593 PF: > { %p842_p7 = scmp.ne.s32.totalorder %s1025_s21, 1 }
 0x594   : > { %v618_v39 = vld [vmem:[#allocation5] sm:$0xff] (!%p842_p7)  ;;  %v617_v40 = vld [vmem:[#allocation4] sm:$0xff] (!%p842_p7)  ;;  %v1044_v41 = vmov (!%p842_p7), 0   ;;  %v621_v43 = vld [vmem:[#allocation3] sm:$0xff] (!%p842_p7)  ;;  %v645_v54 = vlaneseq (!%p842_p7)  ;;  %vm656_vm6 = vcmask (!%p842_p7), 7168  }
 0x595   : > { %616 = sbr.rel (%p842_p7) target bundleno = 1727 (0x6bf), region = 60  ;;  %971 = vset.pattern.permute.xlu0 (!%p842_p7), %v1044_v41  ;;  %v633_v42 = vmul.f32 (!%p842_p7), 3.0590232e-07, %v617_v40  ;;  %v843_v44 = vadd.f32 (!%p842_p7), -2.5, %v621_v43 }
 0x596   : > { %628 = vperm.xlu0 (!%p842_p7), %971, %v618_v39   ;;  %v646_v55 = vand.u32 (!%p842_p7), 127, %v645_v54 }
 0x597   : > { %v623_v45 = vmul.f32 (!%p842_p7), 1.442695, %v843_v44  ;;  %v640_v56 = vsub.f32 (!%p842_p7), 0.0, %v843_v44 }
 0x598   : > { %vm650_vm5 = vcmp.lt.s32.totalorder (!%p842_p7), %v646_v55, 8 }
 0x599   : > { %972 = vpow2.f32 (!%p842_p7), %v623_v45  ;;  %v652_v61 = vld [vmem:[#allocation6] sm:$0xff] (!%p842_p7) }
 0x59a   : > { %636 = vperm.xlu0 (!%p842_p7), %971, %v633_v42  }
 0x5a3   : > { %v973_v46 = vpop.eup %972 }
 0x5a4   : > { %v625_v47 = vmul.f32 0.6, %v973_v46 }
 0x615   : > { %v629_v48 = vpop.permute.xlu0 %628 }
 0x616   : > { %v631_v49 = vsub.f32 %v629_v48, %v625_v47 }
 0x618   : > { %v632_v50 = vmul.f32 1.1111112, %v631_v49 }
 0x619   : > { %v637_v51 = vpop.permute.xlu0 %636 }
 0x61a   : > { %v639_v52 = vmax.f32 %v632_v50, %v637_v51 }
 0x61c   : > { %v641_v53 = vadd.f32 %v639_v52, %v629_v48 }
 0x61e   : > { %974 = vlog2.f32 %v641_v53 }
 0x628   : > { %v975_v57 = vpop.eup %974 }
 0x629   : > { %v643_v58 = vmul.f32 0.6931472, %v975_v57 }
 0x62b   : > { %v644_v59 = vadd.f32 %v643_v58, %v640_v56 }
 0x62d   : > { %v651_v60 = vsel %vm650_vm5, %v644_v59, 0.0 }
 0x62e   : > { %653 = vadd.xlane.f32.xlu1 %v651_v60 }
 0x6bb   : > { %v654_v62 = vpop.xlane.xlu1 %653 }
 0x6bc   : > { %v655_v63 = vadd.f32 %v654_v62, %v652_v61 }
 0x6be   : > { %657 = vst.msk [vmem:[#allocation6] sm:$0xff] %vm656_vm6, %v655_v63 }
 0x6bf PF: > { %659 = sbr.rel (!%p512_p6) target bundleno = 2139 (0x85b), region = 64  ;;  %v665_v0 = vld [vmem:[%s1228_s0] sm:$0xff] (%p512_p6)  ;;  %v1045_v1 = vmov (%p512_p6), 0   ;;  %vm690_vm7 = vcmask (%p512_p6), 7168   ;;  %vm726_vm8 = vcmask (%p512_p6), 261120   ;;  %v725_v7 = vld [vmem:[%s1233_s5 + $0x8] sm:$0xff] (%p512_p6)  ;;  %v660_v24 = vlaneseq (%p512_p6) }
 0x6c0   : > { %976 = vset.pattern.permute.xlu0 (%p512_p6), %v1045_v1  ;;  %v706_v3 = vld [vmem:[%s1232_s4] sm:$0xff] (%p512_p6)  ;;  %v728_v9 = vsel (%p512_p6), %vm726_vm8, %v725_v7, 0.0  ;;  %vm712_vm9 = vcmask (%p512_p6), 523264   ;;  %vm737_vm10 = vcmask (%p512_p6), 253952   ;;  %vm677_vm13 = vcmask (%p512_p6), 64512   ;;  %s1047_s20 = smov (%p512_p6), 1.0  }
 0x6c1   : > { %671 = vperm.xlu0 (%p512_p6), %976, %v665_v0   ;;  %v724_v4 = vld [vmem:[%s1233_s5] sm:$0xff] (%p512_p6)  ;;  %v708_v6 = vmax.f32 (%p512_p6), %v706_v3, 1e-30  ;;  %v707_v15 = vsub.f32 (%p512_p6), 0.0, %v706_v3  ;;  %v1182_v25 = vand.u32 (%p512_p6), 127, %v660_v24  ;;  %v663_v26 = vshrl.u32 (%p512_p6), %v660_v24, 7 }
 0x6c2   : > { %v727_v8 = vsel (%p512_p6), %vm726_vm8, %v724_v4, 0.0  ;;  %v844_v27 = vld [vmem:[%s1229_s1] ss:$0 sm:$0xff] (%p512_p6)  ;;  %v1046_v29 = vmov (%p512_p6), 0.0  }
 0x6c3   : > { %977 = vlog2.f32 (%p512_p6), %v708_v6  ;;  %v729_v10 = vadd.f32 (%p512_p6), %v728_v9, %v727_v8  ;;  %vm674_vm11 = vcmp.ne.s32.totalorder (%p512_p6), %v1182_v25, %v663_v26  ;;  %vm751_vm15 = vcmp.eq.s32.totalorder (%p512_p6), %v1182_v25, 2 }
 0x6c4   : > { %vm750_vm0 = vcmp.eq.s32.totalorder (%p512_p6), %v1182_v25, 1  ;;  %vm749_vm1 = vcmp.eq.s32.totalorder (%p512_p6), %v1182_v25, 0 }
 0x6c5   : > { %v689_v2 = vld [vmem:[#allocation6] sm:$0xff] (%p512_p6)  ;;  %v730_v11 = vrot.slane (%p512_p6), %v729_v10, 4 }
 0x6c6   : > { %v691_v5 = vsel %vm690_vm7, %v689_v2, 0.0 }
 0x6c7   : > { %692 = vadd.xlane.f32.xlu1 %v691_v5  ;;  %v731_v12 = vadd.f32 %v730_v11, %v729_v10 }
 0x6c9   : > { %v732_v13 = vrot.slane %v731_v12, 2 }
 0x6cb   : > { %v733_v14 = vadd.f32 %v732_v13, %v731_v12 }
 0x6cd   : > { %v978_v16 = vpop.eup %977  ;;  %v734_v17 = vrot.slane %v733_v14, 1 }
 0x6ce   : > { %v710_v18 = vmul.f32 0.6931472, %v978_v16 }
 0x6cf   : > { %v735_v19 = vadd.f32 %v734_v17, %v733_v14 }
 0x6d0   : > { %v711_v20 = vmul.f32 %v710_v18, %v707_v15 }
 0x6d1   : > { %v736_v21 = vmul.f32 %v735_v19, %v735_v19 }
 0x6d2   : > { %v713_v22 = vsel %vm712_vm9, %v711_v20, 0.0 }
 0x6d3   : > { %714 = vadd.xlane.f32.xlu1 %v713_v22  ;;  %v738_v23 = vsel %vm737_vm10, %v736_v21, 0.0 }
 0x6d7   : > { %739 = vadd.xlane.f32.xlu1 %v738_v23 }
 0x740   : > { %v672_v28 = vpop.permute.xlu0 %671 }
 0x741   : > { %vm673_vm12 = vcmp.eq.s32.totalorder %v844_v27, %v672_v28 }
 0x742   : > { %vm675_vm14 = vmand %vm673_vm12, %vm674_vm11 }
 0x743   : > { %v676_v30 = vsel %vm675_vm14, 1.0, %v1046_v29 }
 0x744   : > { %v678_v31 = vsel %vm677_vm13, %v676_v30, 0.0 }
 0x745   : > { %679 = vadd.xlane.f32.xlu0 %v678_v31 }
 0x754   : > { %v693_v32 = vpop.xlane.xlu1 %692 }
 0x755   : > { %v694_v33 = vrot.slane %v693_v32, 4 }
 0x757   : > { %v695_v34 = vadd.f32 %v694_v33, %v693_v32 }
 0x759   : > { %v696_v35 = vrot.slane %v695_v34, 2 }
 0x75b   : > { %v697_v38 = vadd.f32 %v696_v35, %v695_v34 }
 0x75d   : > { %v698_v41 = vrot.slane %v697_v38, 1 }
 0x75f   : > { %v699_v44 = vadd.f32 %v698_v41, %v697_v38 }
 0x760   : > { %v715_v46 = vpop.xlane.xlu1 %714 }
 0x761   : > { %v716_v48 = vrot.slane %v715_v46, 4 }
 0x763   : > { %v717_v50 = vadd.f32 %v716_v48, %v715_v46 }
 0x764   : > { %v740_v47 = vpop.xlane.xlu1 %739 }
 0x765   : > { %v741_v49 = vrot.slane %v740_v47, 4  ;;  %v718_v52 = vrot.slane %v717_v50, 2 }
 0x767   : > { %v742_v51 = vadd.f32 %v741_v49, %v740_v47  ;;  %v719_v55 = vadd.f32 %v718_v52, %v717_v50 }
 0x769   : > { %v743_v53 = vrot.slane %v742_v51, 2  ;;  %v720_v57 = vrot.slane %v719_v55, 1 }
 0x76b   : > { %v744_v56 = vadd.f32 %v743_v53, %v742_v51  ;;  %v721_v60 = vadd.f32 %v720_v57, %v719_v55 }
 0x76d   : > { %v745_v58 = vrot.slane %v744_v56, 1 }
 0x76f   : > { %v746_v61 = vadd.f32 %v745_v58, %v744_v56 }
 0x7d2   : > { %v680_v36 = vpop.xlane.xlu0 %679 }
 0x7d3   : > { %v681_v37 = vrot.slane %v680_v36, 4 }
 0x7d5   : > { %v682_v39 = vadd.f32 %v681_v37, %v680_v36 }
 0x7d7   : > { %v683_v40 = vrot.slane %v682_v39, 2 }
 0x7d9   : > { %v684_v42 = vadd.f32 %v683_v40, %v682_v39 }
 0x7db   : > { %v685_v43 = vrot.slane %v684_v42, 1 }
 0x7dd   : > { %v686_v45 = vadd.f32 %v685_v43, %v684_v42 }
 0x7df   : > { %896 = vpush %v686_v45 }
 0x7e0   : > { %898 = vpush %v699_v44 }
 0x810   : > { %s897_s18 = spop %896 }
 0x811   : > { %s688_s19 = sadd.f32 64.0, %s897_s18  ;;  %s899_s27 = spop %898 }
 0x813   : > { %s701_s26 = smax.f32 %s1047_s20, %s688_s19 }
 0x814   : > { %v702_v54 = vstv %s701_s26 }
 0x815   : > { %979 = vrcp.f32 %v702_v54 }
 0x81f   : > { %v980_v59 = vpop.eup %979 }
 0x820   : > { %900 = vpush %v980_v59 }
 0x821   : > { %902 = vpush %v721_v60 }
 0x822   : > { %904 = vpush %v746_v61 }
 0x851   : > { %s901_s28 = spop %900 }
 0x852   : > { %s705_s29 = smul.f32 %s901_s28, %s899_s27  ;;  %s903_s30 = spop %902 }
 0x853   : > { %s723_s7 = smul.f32 0.03125, %s903_s30  ;;  %s905_s8 = spop %904 }
 0x854   : > { %s748_s9 = smul.f32 0.0009765625, %s905_s8  ;;  %v756_v1 = vstv %s705_s29 }
 0x855   : > { %v754_v62 = vstv %s723_s7 }
 0x856   : > { %v752_v63 = vstv %s748_s9 }
 0x857   : > { %v753_v0 = vsel %vm751_vm15, %v752_v63, 0.0 }
 0x858   : > { %v755_v2 = vsel %vm750_vm0, %v754_v62, %v753_v0 }
 0x859   : > { %v757_v3 = vsel %vm749_vm1, %v756_v1, %v755_v2 }
 0x85a   : > { %758 = vst [vmem:[#allocation7] sm:$0x1] %v757_v3 }
 0x85b PF: > { %p1193_p8 = scmp.eq.s32.totalorder %s818_s24, 1  ;;  %s1048_s11 = smov [#allocation7]  }
 0x85c   : > { %s766_s12 = sshll.u32 %s1048_s11, 4  ;;  %s767_s12 = int_to_ptr.vmem [resolvable:$true] %s766_s12 }
 0x85d   : > { %s981_s13 = scalar_lea.vmem %s767_s12, 16  ;;  %s987_s14 = scalar_lea.vmem %s767_s12, 32 }
 0x85e   : > { %p982_p9 = scmp.ne.s32.totalorder %s767_s12, %s981_s13  ;;  %p988_p12 = scmp.lt.s32.totalorder %s767_s12, %s767_s12 }
 0x85f   : > { %p989_p13 = scmp.lt.s32.totalorder %s987_s14, %s981_s13 }
 0x860   : > { %p983_p10 = pnand %p982_p9, %p1193_p8 }
 0x861   : > { %p990_p0 = por %p989_p13, %p988_p12 }
 0x862   : > { %p984_p11 = pneg %p983_p10 }
 0x864   : > { %p991_p1 = pnand %p990_p0, %p984_p11 }
 0x866   : > { %994 = shalt.err (!%p991_p1)
}
 0x867   : > { %s995_s15 = scalar_lea.hbm %s1234_s6, 16 }
 0x868   : > { %p996_p2 = scmp.ne.s32.totalorder %s1234_s6, %s995_s15  ;;  %p1001_p5 = scmp.lt.u32.totalorder %s995_s15, %s1234_s6 }
 0x86a   : > { %p997_p3 = pnand %p996_p2, %p1193_p8 }
 0x86c   : > { %p998_p4 = pneg %p997_p3 }
 0x86e   : > { %p1003_p6 = pnand %p1001_p5, %p998_p4 }
 0x870   : > { %1006 = shalt.err (!%p1003_p6)
}
 0x871   : > { %907 = dma.vmem_to_hbm [thread:$0]  (%p1193_p8), %s767_s12, 16, %s1234_s6, [#allocation8]  }
 0x872   : > { %1020 = dma.done.wait (%p1193_p8), [#allocation8], 16  }
 0x873   : > { %1022 = vsyncadd (%p1193_p8), [#allocation8], 4294967280 }
 0x874 PF: > { %s17_s23 = sadd.s32 1, %s1033_s23   ;;  %s1236_s21 = smov %s1029_s22 }
 0x875   : > { %p14_p7 = scmp.ge.s32.totalorder %s17_s23, 4   ;;  %s1237_s22 = smov %s1239_s25 }
 0x877   :  { %16 = sbr.rel (!%p14_p7) target bundleno = 2 (0x2), region = 93 }
 0x87e   :  { %779 = vsyncpa [#allocation8], 1 }
 0x87f   :  { %781 = vsyncpa [#allocation8 + $0x1], 1 }

</bundles_post_ra>
